<compile_context>
chip_gen: v7x
topology: tpu7x:2x2x1
jax: 0.10.0
libtpu: 0.0.40
codegen_flags: <defaults>
</compile_context>

<pallas_src>
import functools

import jax
import jax.numpy as jnp
from jax import lax
from jax.experimental import pallas as pl
from jax.experimental.pallas import tpu as pltpu


# ----------------------------------------------------------------------------
# Pallas kernel: fused depthwise 3x3 stencil (1x1 folded in) + bias + LeakyReLU
# ----------------------------------------------------------------------------
def _firstbody_kernel(x_ref, w_ref, b_ref, o_ref, *, C, TH):
    # x_ref : (1, TH+2, LANE_IN)  H/W-padded rows of one H-tile of one image,
    #                             lanes flattened as (w_padded, c).
    # w_ref : (9, WCP)            BN-folded per-(dy,dx) weight rows (1x1 branch
    #                             folded into the centre tap), tiled over w.
    # b_ref : (1, WCP)            combined BN-folded bias of both branches.
    # o_ref : (1, TH, WCP)        lane-dense output tile.
    wcp = o_ref.shape[-1]
    w = w_ref[...]                                   # (9, WCP), VMEM resident
    acc = jnp.zeros((TH, wcp), jnp.float32) + b_ref[...]
    for dy in range(3):
        xr = x_ref[0, dy:dy + TH, :]                 # (TH, LANE_IN), static slice
        for dx in range(3):
            acc = acc + xr[:, dx * C: dx * C + wcp] * w[dy * 3 + dx, :]
    # LeakyReLU with PyTorch default negative_slope = 0.01
    o_ref[0] = jnp.where(acc > 0, acc, 0.01 * acc).astype(o_ref.dtype)


def _round_up(x, m):
    return ((x + m - 1) // m) * m


def _choose_tile_rows(h, lane_in, wcp):
    # Keep the double-buffered in/out blocks plus a few row-sized VMEM
    # temporaries under ~10 MiB (safe for v5e/v6e/v7x scoped VMEM budgets).
    bytes_per_row = 4 * (2 * lane_in + 6 * wcp)
    th = max(8, (10 * 1024 * 1024) // max(bytes_per_row, 1))
    if th >= h:
        return h, 1                                  # one tile per image
    nt = -(-h // th)
    return th, nt


def _firstbody_pallas(x_tiles, w9, bias_row, *, c, th):
    g, thp2, lane_in = x_tiles.shape
    wcp = w9.shape[1]
    kernel = functools.partial(_firstbody_kernel, C=c, TH=th)
    return pl.pallas_call(
        kernel,
        out_shape=jax.ShapeDtypeStruct((g, th, wcp), jnp.float32),
        grid_spec=pltpu.PrefetchScalarGridSpec(
            num_scalar_prefetch=0,
            grid=(g,),
            in_specs=[
                pl.BlockSpec((1, thp2, lane_in), lambda i: (i, 0, 0)),
                pl.BlockSpec((9, wcp), lambda i: (0, 0)),   # resident weights
                pl.BlockSpec((1, wcp), lambda i: (0, 0)),   # resident bias
            ],
            out_specs=pl.BlockSpec((1, th, wcp), lambda i: (i, 0, 0)),
        ),
        compiler_params=pltpu.CompilerParams(
            dimension_semantics=("parallel",),
            vmem_limit_bytes=32 * 1024 * 1024,
        ),
    )(x_tiles, w9, bias_row)


# ----------------------------------------------------------------------------
# Parameter construction + BN folding (deterministic, in-script)
# ----------------------------------------------------------------------------
def make_params(channels, key):
    k = jax.random.split(key, 4)
    c = channels
    ar = jnp.arange(c, dtype=jnp.float32)
    p = {}
    # Depthwise Conv1x1 (groups=C): weight (C, 1, 1, 1), bias (C,)
    p["w1"] = jax.random.normal(k[0], (c, 1, 1, 1), jnp.float32) * 0.2
    p["b1"] = jax.random.normal(k[1], (c,), jnp.float32) * 0.1
    # Depthwise Conv3x3 (groups=C): weight (C, 1, 3, 3), bias (C,)
    p["w3"] = jax.random.normal(k[2], (c, 1, 3, 3), jnp.float32) * 0.2
    p["b3"] = jax.random.normal(k[3], (c,), jnp.float32) * 0.1
    # BatchNorm (eval-mode running stats), deterministic non-trivial values.
    p["bn1_gamma"] = 1.0 + 0.10 * ar
    p["bn1_beta"] = 0.05 * ar
    p["bn1_mean"] = 0.02 * ar
    p["bn1_var"] = 1.0 + 0.03 * ar
    p["bn3_gamma"] = 1.0 - 0.05 * ar
    p["bn3_beta"] = -0.02 * ar
    p["bn3_mean"] = 0.01 * ar
    p["bn3_var"] = 1.0 + 0.02 * ar
    return p


def fold_bn(w, b, gamma, beta, mean, var, eps=1e-5):
    # w: (C, 1, kh, kw) depthwise weights, b: (C,)
    scale = gamma / jnp.sqrt(var + eps)
    return w * scale[:, None, None, None], beta + (b - mean) * scale


# ----------------------------------------------------------------------------
# Forward pass (layout glue in JAX, fused stencil in Pallas)
# ----------------------------------------------------------------------------
@jax.jit
def firstbody_forward(x_nchw, params):
    n, c, h, w = x_nchw.shape

    # Fold eval-mode BN into both depthwise branches.
    # TODO(synk): training-mode BatchNorm (batch statistics) is not implemented.
    w1e, b1e = fold_bn(params["w1"], params["b1"], params["bn1_gamma"],
                       params["bn1_beta"], params["bn1_mean"], params["bn1_var"])
    w3e, b3e = fold_bn(params["w3"], params["b3"], params["bn3_gamma"],
                       params["bn3_beta"], params["bn3_mean"], params["bn3_var"])

    # Fold the 1x1 branch into the centre tap of the 3x3 stencil
    # (same spatial sampling: stride 1, centre of the pad-1 window).
    w3f = w3e[:, 0, :, :].at[:, 1, 1].add(w1e[:, 0, 0, 0])   # (C, 3, 3)
    b_comb = b1e + b3e                                       # (C,)

    wc = w * c
    wcp = _round_up(wc, 128)          # lane-dense output width
    lane_in = wcp + 2 * c             # input lanes incl. dx halo (>= (W+2)*C)

    # NHWC, zero-pad H and W by 1 on each side, flatten lanes as (w_padded, c).
    xh = jnp.transpose(x_nchw, (0, 2, 3, 1)).astype(jnp.float32)   # (N,H,W,C)
    xp = jnp.pad(xh, ((0, 0), (1, 1), (1, 1), (0, 0)))             # (N,H+2,W+2,C)
    xl = xp.reshape(n, h + 2, (w + 2) * c)
    xl = jnp.pad(xl, ((0, 0), (0, 0), (0, lane_in - (w + 2) * c)))

    # H tiling (one tile per image when it fits VMEM; halo rows replicated
    # per-tile otherwise -> negligible extra HBM, non-overlapping blocks).
    th, nt = _choose_tile_rows(h, lane_in, wcp)
    if nt == 1:
        x_tiles = xl.reshape(n, 1, h + 2, lane_in)
    else:
        hp = nt * th
        xl = jnp.pad(xl, ((0, 0), (0, hp - h), (0, 0)))            # (N, hp+2, .)
        x_tiles = jnp.stack([xl[:, t * th: t * th + th + 2]
                             for t in range(nt)], axis=1)
    x_tiles = x_tiles.reshape(n * nt, th + 2, lane_in)

    # Weight rows: lane (w*C + c) of row (dy*3 + dx) holds w3f[c, dy, dx].
    w9 = jnp.stack([jnp.tile(w3f[:, dy, dx], w)
                    for dy in range(3) for dx in range(3)], axis=0)
    w9 = jnp.pad(w9, ((0, 0), (0, wcp - wc))).astype(jnp.float32)
    bias_row = jnp.pad(jnp.tile(b_comb, w),
                       (0, wcp - wc)).reshape(1, wcp).astype(jnp.float32)

    out = _firstbody_pallas(x_tiles, w9, bias_row, c=c, th=th)     # (N*nt,th,wcp)
    out = out.reshape(n, nt * th, wcp)[:, :h, :wc].reshape(n, h, w, c)
    return jnp.transpose(out, (0, 3, 1, 2))                        # back to NCHW


# ----------------------------------------------------------------------------
# Pure-JAX reference (for correctness sanity check)
# ----------------------------------------------------------------------------
def firstbody_reference(x_nchw, params):
    c = x_nchw.shape[1]
    w1e, b1e = fold_bn(params["w1"], params["b1"], params["bn1_gamma"],
                       params["bn1_beta"], params["bn1_mean"], params["bn1_var"])
    w3e, b3e = fold_bn(params["w3"], params["b3"], params["bn3_gamma"],
                       params["bn3_beta"], params["bn3_mean"], params["bn3_var"])
    dn = lax.conv_dimension_numbers(x_nchw.shape, w1e.shape,
                                    ("NCHW", "OIHW", "NCHW"))
    y1 = lax.conv_general_dilated(x_nchw, w1e, (1, 1), "VALID",
                                  dimension_numbers=dn,
                                  feature_group_count=c) + b1e[None, :, None, None]
    y3 = lax.conv_general_dilated(x_nchw, w3e, (1, 1), ((1, 1), (1, 1)),
                                  dimension_numbers=dn,
                                  feature_group_count=c) + b3e[None, :, None, None]
    y = y1 + y3
    return jnp.where(y > 0, y, 0.01 * y)


# ----------------------------------------------------------------------------
if __name__ == "__main__":
    key = jax.random.PRNGKey(0)
    k_x, k_p = jax.random.split(key)

    N, C, H, W = 2, 4, 16, 16
    x = jax.random.normal(k_x, (N, C, H, W), jnp.float32)
    params = make_params(C, k_p)

    out = firstbody_forward(x, params)
    out = jax.block_until_ready(out)

    ref = firstbody_reference(x, params)
    assert out.shape == (N, C, H, W), out.shape
    assert jnp.allclose(out, ref, atol=1e-4, rtol=1e-4), "mismatch vs reference"

    print("KERNEL_OK")
</pallas_src>

<mosaic_0001>
module attributes {stable_mosaic.version = 11 : i64} {
  func.func @_firstbody_kernel(%arg0: i32, %arg1: memref<1x18x136xf32, #tpu.memory_space<vmem>>, %arg2: memref<9x128xf32, #tpu.memory_space<vmem>>, %arg3: memref<1x128xf32, #tpu.memory_space<vmem>>, %arg4: memref<1x16x128xf32, #tpu.memory_space<vmem>>) attributes {dimension_semantics = [#tpu.dimension_semantics<parallel>], iteration_bounds = array<i64: 2>, scalar_prefetch = 0 : i64, scratch_operands = 0 : i64, tpu.core_type = #tpu.core_type<tc>, window_params = [{transform_indices = @transform_0, window_bounds = array<i64: 1, 18, 136>}, {pipeline_mode = #tpu.pipeline_mode<synchronous>, transform_indices = @transform_1, window_bounds = array<i64: 9, 128>}, {pipeline_mode = #tpu.pipeline_mode<synchronous>, transform_indices = @transform_2, window_bounds = array<i64: 1, 128>}, {transform_indices = @transform_3, window_bounds = array<i64: 1, 16, 128>}]} {
    %c0 = arith.constant 0 : index
    %c0_0 = arith.constant 0 : index
    %0 = vector.load %arg2[%c0, %c0_0] : memref<9x128xf32, #tpu.memory_space<vmem>>, vector<9x128xf32>
    %cst = arith.constant 0.000000e+00 : f32
    %1 = vector.broadcast %cst : f32 to vector<16x128xf32>
    %c0_1 = arith.constant 0 : index
    %c0_2 = arith.constant 0 : index
    %2 = vector.load %arg3[%c0_1, %c0_2] : memref<1x128xf32, #tpu.memory_space<vmem>>, vector<1x128xf32>
    %3 = vector.broadcast %2 : vector<1x128xf32> to vector<16x128xf32>
    %4 = arith.addf %1, %3 : vector<16x128xf32>
    %c0_3 = arith.constant 0 : index
    %c0_4 = arith.constant 0 : index
    %c0_5 = arith.constant 0 : index
    %5 = vector.load %arg1[%c0_3, %c0_4, %c0_5] : memref<1x18x136xf32, #tpu.memory_space<vmem>>, vector<1x16x136xf32>
    %6 = vector.shape_cast %5 : vector<1x16x136xf32> to vector<16x136xf32>
    %7 = vector.extract_strided_slice %6 {offsets = [0, 0], sizes = [16, 128], strides = [1, 1]} : vector<16x136xf32> to vector<16x128xf32>
    %8 = vector.extract_strided_slice %0 {offsets = [0, 0], sizes = [1, 128], strides = [1, 1]} : vector<9x128xf32> to vector<1x128xf32>
    %9 = vector.shape_cast %8 : vector<1x128xf32> to vector<128xf32>
    %10 = vector.shape_cast %9 : vector<128xf32> to vector<1x128xf32>
    %11 = vector.broadcast %10 : vector<1x128xf32> to vector<16x128xf32>
    %12 = arith.mulf %7, %11 : vector<16x128xf32>
    %13 = arith.addf %4, %12 : vector<16x128xf32>
    %14 = vector.extract_strided_slice %6 {offsets = [0, 4], sizes = [16, 128], strides = [1, 1]} : vector<16x136xf32> to vector<16x128xf32>
    %15 = vector.extract_strided_slice %0 {offsets = [1, 0], sizes = [1, 128], strides = [1, 1]} : vector<9x128xf32> to vector<1x128xf32>
    %16 = vector.shape_cast %15 : vector<1x128xf32> to vector<128xf32>
    %17 = vector.shape_cast %16 : vector<128xf32> to vector<1x128xf32>
    %18 = vector.broadcast %17 : vector<1x128xf32> to vector<16x128xf32>
    %19 = arith.mulf %14, %18 : vector<16x128xf32>
    %20 = arith.addf %13, %19 : vector<16x128xf32>
    %21 = vector.extract_strided_slice %6 {offsets = [0, 8], sizes = [16, 128], strides = [1, 1]} : vector<16x136xf32> to vector<16x128xf32>
    %22 = vector.extract_strided_slice %0 {offsets = [2, 0], sizes = [1, 128], strides = [1, 1]} : vector<9x128xf32> to vector<1x128xf32>
    %23 = vector.shape_cast %22 : vector<1x128xf32> to vector<128xf32>
    %24 = vector.shape_cast %23 : vector<128xf32> to vector<1x128xf32>
    %25 = vector.broadcast %24 : vector<1x128xf32> to vector<16x128xf32>
    %26 = arith.mulf %21, %25 : vector<16x128xf32>
    %27 = arith.addf %20, %26 : vector<16x128xf32>
    %c0_6 = arith.constant 0 : index
    %c1 = arith.constant 1 : index
    %c0_7 = arith.constant 0 : index
    %28 = vector.load %arg1[%c0_6, %c1, %c0_7] : memref<1x18x136xf32, #tpu.memory_space<vmem>>, vector<1x16x136xf32>
    %29 = vector.shape_cast %28 : vector<1x16x136xf32> to vector<16x136xf32>
    %30 = vector.extract_strided_slice %29 {offsets = [0, 0], sizes = [16, 128], strides = [1, 1]} : vector<16x136xf32> to vector<16x128xf32>
    %31 = vector.extract_strided_slice %0 {offsets = [3, 0], sizes = [1, 128], strides = [1, 1]} : vector<9x128xf32> to vector<1x128xf32>
    %32 = vector.shape_cast %31 : vector<1x128xf32> to vector<128xf32>
    %33 = vector.shape_cast %32 : vector<128xf32> to vector<1x128xf32>
    %34 = vector.broadcast %33 : vector<1x128xf32> to vector<16x128xf32>
    %35 = arith.mulf %30, %34 : vector<16x128xf32>
    %36 = arith.addf %27, %35 : vector<16x128xf32>
    %37 = vector.extract_strided_slice %29 {offsets = [0, 4], sizes = [16, 128], strides = [1, 1]} : vector<16x136xf32> to vector<16x128xf32>
    %38 = vector.extract_strided_slice %0 {offsets = [4, 0], sizes = [1, 128], strides = [1, 1]} : vector<9x128xf32> to vector<1x128xf32>
    %39 = vector.shape_cast %38 : vector<1x128xf32> to vector<128xf32>
    %40 = vector.shape_cast %39 : vector<128xf32> to vector<1x128xf32>
    %41 = vector.broadcast %40 : vector<1x128xf32> to vector<16x128xf32>
    %42 = arith.mulf %37, %41 : vector<16x128xf32>
    %43 = arith.addf %36, %42 : vector<16x128xf32>
    %44 = vector.extract_strided_slice %29 {offsets = [0, 8], sizes = [16, 128], strides = [1, 1]} : vector<16x136xf32> to vector<16x128xf32>
    %45 = vector.extract_strided_slice %0 {offsets = [5, 0], sizes = [1, 128], strides = [1, 1]} : vector<9x128xf32> to vector<1x128xf32>
    %46 = vector.shape_cast %45 : vector<1x128xf32> to vector<128xf32>
    %47 = vector.shape_cast %46 : vector<128xf32> to vector<1x128xf32>
    %48 = vector.broadcast %47 : vector<1x128xf32> to vector<16x128xf32>
    %49 = arith.mulf %44, %48 : vector<16x128xf32>
    %50 = arith.addf %43, %49 : vector<16x128xf32>
    %c0_8 = arith.constant 0 : index
    %c2 = arith.constant 2 : index
    %c0_9 = arith.constant 0 : index
    %51 = vector.load %arg1[%c0_8, %c2, %c0_9] : memref<1x18x136xf32, #tpu.memory_space<vmem>>, vector<1x16x136xf32>
    %52 = vector.shape_cast %51 : vector<1x16x136xf32> to vector<16x136xf32>
    %53 = vector.extract_strided_slice %52 {offsets = [0, 0], sizes = [16, 128], strides = [1, 1]} : vector<16x136xf32> to vector<16x128xf32>
    %54 = vector.extract_strided_slice %0 {offsets = [6, 0], sizes = [1, 128], strides = [1, 1]} : vector<9x128xf32> to vector<1x128xf32>
    %55 = vector.shape_cast %54 : vector<1x128xf32> to vector<128xf32>
    %56 = vector.shape_cast %55 : vector<128xf32> to vector<1x128xf32>
    %57 = vector.broadcast %56 : vector<1x128xf32> to vector<16x128xf32>
    %58 = arith.mulf %53, %57 : vector<16x128xf32>
    %59 = arith.addf %50, %58 : vector<16x128xf32>
    %60 = vector.extract_strided_slice %52 {offsets = [0, 4], sizes = [16, 128], strides = [1, 1]} : vector<16x136xf32> to vector<16x128xf32>
    %61 = vector.extract_strided_slice %0 {offsets = [7, 0], sizes = [1, 128], strides = [1, 1]} : vector<9x128xf32> to vector<1x128xf32>
    %62 = vector.shape_cast %61 : vector<1x128xf32> to vector<128xf32>
    %63 = vector.shape_cast %62 : vector<128xf32> to vector<1x128xf32>
    %64 = vector.broadcast %63 : vector<1x128xf32> to vector<16x128xf32>
    %65 = arith.mulf %60, %64 : vector<16x128xf32>
    %66 = arith.addf %59, %65 : vector<16x128xf32>
    %67 = vector.extract_strided_slice %52 {offsets = [0, 8], sizes = [16, 128], strides = [1, 1]} : vector<16x136xf32> to vector<16x128xf32>
    %68 = vector.extract_strided_slice %0 {offsets = [8, 0], sizes = [1, 128], strides = [1, 1]} : vector<9x128xf32> to vector<1x128xf32>
    %69 = vector.shape_cast %68 : vector<1x128xf32> to vector<128xf32>
    %70 = vector.shape_cast %69 : vector<128xf32> to vector<1x128xf32>
    %71 = vector.broadcast %70 : vector<1x128xf32> to vector<16x128xf32>
    %72 = arith.mulf %67, %71 : vector<16x128xf32>
    %73 = arith.addf %66, %72 : vector<16x128xf32>
    %cst_10 = arith.constant 0.000000e+00 : f32
    %74 = vector.broadcast %cst_10 : f32 to vector<16x128xf32>
    %75 = arith.cmpf ogt, %73, %74 : vector<16x128xf32>
    %cst_11 = arith.constant 0.00999999977 : f32
    %76 = vector.broadcast %cst_11 : f32 to vector<16x128xf32>
    %77 = arith.mulf %76, %73 : vector<16x128xf32>
    %78 = arith.select %75, %73, %77 : vector<16x128xi1>, vector<16x128xf32>
    %c0_12 = arith.constant 0 : index
    %c0_13 = arith.constant 0 : index
    %c0_14 = arith.constant 0 : index
    %79 = vector.load %arg4[%c0_12, %c0_13, %c0_14] : memref<1x16x128xf32, #tpu.memory_space<vmem>>, vector<1x16x128xf32>
    %80 = vector.shape_cast %79 : vector<1x16x128xf32> to vector<16x128xf32>
    %81 = vector.shape_cast %78 : vector<16x128xf32> to vector<1x16x128xf32>
    tpu.vector_store %arg4[%c0_12, %c0_13, %c0_14], %81 {strides = array<i32>} : memref<1x16x128xf32, #tpu.memory_space<vmem>>, vector<1x16x128xf32>,
    return
  }
  func.func @transform_0(%arg0: i32) -> (i32, i32, i32) {
    %c0_i32 = arith.constant 0 : i32
    %c0_i32_0 = arith.constant 0 : i32
    %c0_i32_1 = arith.constant 0 : i32
    return %arg0, %c0_i32, %c0_i32_0 : i32, i32, i32
  }
  func.func @transform_1(%arg0: i32) -> (i32, i32) {
    %c0_i32 = arith.constant 0 : i32
    %c0_i32_0 = arith.constant 0 : i32
    %c0_i32_1 = arith.constant 0 : i32
    return %c0_i32, %c0_i32_0 : i32, i32
  }
  func.func @transform_2(%arg0: i32) -> (i32, i32) {
    %c0_i32 = arith.constant 0 : i32
    %c0_i32_0 = arith.constant 0 : i32
    %c0_i32_1 = arith.constant 0 : i32
    return %c0_i32, %c0_i32_0 : i32, i32
  }
  func.func @transform_3(%arg0: i32) -> (i32, i32, i32) {
    %c0_i32 = arith.constant 0 : i32
    %c0_i32_0 = arith.constant 0 : i32
    %c0_i32_1 = arith.constant 0 : i32
    return %arg0, %c0_i32, %c0_i32_0 : i32, i32, i32
  }
}

</mosaic_0001>

<bundles_post_ra>
// kernel: tile.43
= control target key start
LH: loop header
LB: loop body
LE: loop exit
PB: predicated region body
PF: predicated region fallthrough
CT: control target
= control target key end

     0   :  { %s28_s0 = inlined_call_operand.vmem [shape: f32[4], index: 0, kind: input, shape index: {}]   ;;  %s29_s1 = inlined_call_operand.vmem [shape: f32[16,4], index: 1, kind: output, shape index: {}]  }
   0x1   :  { %v4_v0 = vld [vmem:[%s28_s0] ss:$0 sm:$0xff] }
   0x2   :  { %5 = vst [vmem:[%s29_s1] sm:$0xff] %v4_v0  ;;  %8 = vst [vmem:[%s29_s1 + $0x8] sm:$0xff] %v4_v0 }

// kernel: tile.68
= control target key start
LH: loop header
LB: loop body
LE: loop exit
PB: predicated region body
PF: predicated region fallthrough
CT: control target
= control target key end

     0   :  { %s131_s10 = smov 60   ;;  %s132_s11 = smov 52   ;;  %vm3_vm0 = vcmask 31744   ;;  %vm9_vm1 = vcmask 523744   ;;  %vm15_vm2 = vcmask 490944   ;;  %vm21_vm3 = vcmask 458144   ;;  %s207_s0 = inlined_call_operand.vmem [shape: f32[16,4], index: 0, kind: input, shape index: {}]   ;;  %s208_s1 = inlined_call_operand.vmem [shape: f32[1,64], index: 1, kind: output, shape index: {}]  }
   0x1   :  { %v101_v0 = vld [vmem:[%s207_s0 + $0xf] sm:$0x1]   ;;  %v103_v1 = vld [vmem:[%s207_s0 + $0xd] sm:$0x1]   ;;  %v102_v2 = vld [vmem:[%s207_s0 + $0xe] sm:$0x1]  }
   0x2   :  { %7 = vrot.lane.b32.xlu0 %v101_v0, %s131_s10  ;;  %19 = vrot.lane.b32.xlu1 %v103_v1, %s132_s11  ;;  %v104_v3 = vld [vmem:[%s207_s0 + $0xc] sm:$0x1]   ;;  %s133_s16 = smov 56   ;;  %s134_s17 = smov 48   ;;  %v105_v4 = vld [vmem:[%s207_s0 + $0xb] sm:$0x1]  }
   0x3   :  { %v106_v5 = vld [vmem:[%s207_s0 + $0xa] sm:$0x1]   ;;  %v2_v6 = vld [vmem:[%s207_s0] sm:$0x1]   ;;  %s135_s24 = smov 44   ;;  %s136_s25 = smov 40  }
   0x4   :  { %4 = vst.msk [vmem:[#allocation0] sm:$0x1] %vm3_vm0, %v2_v6   ;;  %v107_v7 = vld [vmem:[%s207_s0 + $0x9] sm:$0x1]   ;;  %v108_v8 = vld [vmem:[%s207_s0 + $0x8] sm:$0x1]  }
   0x5   :  { %s137_s30 = smov 36   ;;  %s138_s2 = smov 32   ;;  %v109_v9 = vld [vmem:[%s207_s0 + $0x7] sm:$0x1]   ;;  %v110_v10 = vld [vmem:[%s207_s0 + $0x6] sm:$0x1]  }
   0x6   :  { %13 = vrot.lane.b32.xlu0 %v102_v2, %s133_s16  ;;  %25 = vrot.lane.b32.xlu1 %v104_v3, %s134_s17  ;;  %s139_s7 = smov 28   ;;  %s140_s8 = smov 24   ;;  %v111_v11 = vld [vmem:[%s207_s0 + $0x5] sm:$0x1]   ;;  %v112_v12 = vld [vmem:[%s207_s0 + $0x4] sm:$0x1]  }
   0x7   :  { %s141_s13 = smov 20   ;;  %s142_s14 = smov 16   ;;  %v113_v13 = vld [vmem:[%s207_s0 + $0x3] sm:$0x1]   ;;  %v114_v14 = vld [vmem:[%s207_s0 + $0x2] sm:$0x1]  }
   0x8   :  { %s143_s19 = smov 12   ;;  %s144_s20 = smov 8   ;;  %v115_v15 = vld [vmem:[%s207_s0 + $0x1] sm:$0x1]   ;;  %vm27_vm4 = vcmask 425344   ;;  %vm33_vm5 = vcmask 392544  }
   0x9   :  { %s145_s0 = smov 4   ;;  %vm39_vm6 = vcmask 359744   ;;  %vm45_vm7 = vcmask 326944   ;;  %vm51_vm8 = vcmask 294144   ;;  %vm57_vm9 = vcmask 261344  }
   0xa   :  { %31 = vrot.lane.b32.xlu0 %v105_v4, %s135_s24  ;;  %37 = vrot.lane.b32.xlu1 %v106_v5, %s136_s25  ;;  %vm63_vm10 = vcmask 228544   ;;  %vm69_vm11 = vcmask 195744   ;;  %vm75_vm12 = vcmask 162944   ;;  %vm81_vm13 = vcmask 130144  }
   0xb   :  { %vm87_vm14 = vcmask 97344   ;;  %vm93_vm15 = vcmask 64544  }
   0xe   :  { %43 = vrot.lane.b32.xlu0 %v107_v7, %s137_s30  ;;  %49 = vrot.lane.b32.xlu1 %v108_v8, %s138_s2 }
  0x12   :  { %55 = vrot.lane.b32.xlu0 %v109_v9, %s139_s7  ;;  %61 = vrot.lane.b32.xlu1 %v110_v10, %s140_s8 }
  0x16   :  { %67 = vrot.lane.b32.xlu0 %v111_v11, %s141_s13  ;;  %73 = vrot.lane.b32.xlu1 %v112_v12, %s142_s14 }
  0x1a   :  { %79 = vrot.lane.b32.xlu0 %v113_v13, %s143_s19  ;;  %85 = vrot.lane.b32.xlu1 %v114_v14, %s144_s20 }
  0x1e   :  { %91 = vrot.lane.b32.xlu0 %v115_v15, %s145_s0 }
  0x74   :  { %v8_v16 = vpop.permute.xlu0 %7   ;;  %v20_v17 = vpop.permute.xlu1 %19  }
  0x75   :  { %10 = vst.msk [vmem:[#allocation0] sm:$0x1] %vm9_vm1, %v8_v16  }
  0x78   :  { %v14_v18 = vpop.permute.xlu0 %13   ;;  %v26_v19 = vpop.permute.xlu1 %25  }
  0x79   :  { %16 = vst.msk [vmem:[#allocation0] sm:$0x1] %vm15_vm2, %v14_v18  }
  0x7a   :  { %22 = vst.msk [vmem:[#allocation0] sm:$0x1] %vm21_vm3, %v20_v17  }
  0x7b   :  { %28 = vst.msk [vmem:[#allocation0] sm:$0x1] %vm27_vm4, %v26_v19  }
  0x7c   :  { %v32_v20 = vpop.permute.xlu0 %31   ;;  %v38_v21 = vpop.permute.xlu1 %37  }
  0x7d   :  { %34 = vst.msk [vmem:[#allocation0] sm:$0x1] %vm33_vm5, %v32_v20  }
  0x7e   :  { %40 = vst.msk [vmem:[#allocation0] sm:$0x1] %vm39_vm6, %v38_v21  }
  0x80   :  { %v44_v22 = vpop.permute.xlu0 %43   ;;  %v50_v23 = vpop.permute.xlu1 %49  }
  0x81   :  { %46 = vst.msk [vmem:[#allocation0] sm:$0x1] %vm45_vm7, %v44_v22  }
  0x82   :  { %52 = vst.msk [vmem:[#allocation0] sm:$0x1] %vm51_vm8, %v50_v23  }
  0x84   :  { %v56_v24 = vpop.permute.xlu0 %55   ;;  %v62_v25 = vpop.permute.xlu1 %61  }
  0x85   :  { %58 = vst.msk [vmem:[#allocation0] sm:$0x1] %vm57_vm9, %v56_v24  }
  0x86   :  { %64 = vst.msk [vmem:[#allocation0] sm:$0x1] %vm63_vm10, %v62_v25  }
  0x88   :  { %v68_v26 = vpop.permute.xlu0 %67   ;;  %v74_v27 = vpop.permute.xlu1 %73  }
  0x89   :  { %70 = vst.msk [vmem:[#allocation0] sm:$0x1] %vm69_vm11, %v68_v26  }
  0x8a   :  { %76 = vst.msk [vmem:[#allocation0] sm:$0x1] %vm75_vm12, %v74_v27  }
  0x8c   :  { %v80_v28 = vpop.permute.xlu0 %79   ;;  %v86_v29 = vpop.permute.xlu1 %85  }
  0x8d   :  { %82 = vst.msk [vmem:[#allocation0] sm:$0x1] %vm81_vm13, %v80_v28  }
  0x8e   :  { %88 = vst.msk [vmem:[#allocation0] sm:$0x1] %vm87_vm14, %v86_v29  }
  0x90   :  { %v92_v30 = vpop.permute.xlu0 %91  }
  0x91   :  { %94 = vst.msk [vmem:[#allocation0] sm:$0x1] %vm93_vm15, %v92_v30  }
  0x98   :  { %v98_v31 = vld [vmem:[#allocation0] sm:$0x1] }
  0x99   :  { %100 = vst [vmem:[%s208_s1] sm:$0x1] %v98_v31 }

// kernel: tile.81
= control target key start
LH: loop header
LB: loop body
LE: loop exit
PB: predicated region body
PF: predicated region fallthrough
CT: control target
= control target key end

     0   :  { %s131_s10 = smov 60   ;;  %s132_s11 = smov 52   ;;  %vm3_vm0 = vcmask 31744   ;;  %vm9_vm1 = vcmask 523744   ;;  %vm15_vm2 = vcmask 490944   ;;  %vm21_vm3 = vcmask 458144   ;;  %s207_s0 = inlined_call_operand.vmem [shape: f32[16,4], index: 0, kind: input, shape index: {}]   ;;  %s208_s1 = inlined_call_operand.vmem [shape: f32[64], index: 1, kind: output, shape index: {}]  }
   0x1   :  { %v101_v0 = vld [vmem:[%s207_s0 + $0xf] sm:$0x1]   ;;  %v103_v1 = vld [vmem:[%s207_s0 + $0xd] sm:$0x1]   ;;  %v102_v2 = vld [vmem:[%s207_s0 + $0xe] sm:$0x1]  }
   0x2   :  { %7 = vrot.lane.b32.xlu0 %v101_v0, %s131_s10  ;;  %19 = vrot.lane.b32.xlu1 %v103_v1, %s132_s11  ;;  %v104_v3 = vld [vmem:[%s207_s0 + $0xc] sm:$0x1]   ;;  %s133_s16 = smov 56   ;;  %s134_s17 = smov 48   ;;  %v105_v4 = vld [vmem:[%s207_s0 + $0xb] sm:$0x1]  }
   0x3   :  { %v106_v5 = vld [vmem:[%s207_s0 + $0xa] sm:$0x1]   ;;  %v2_v6 = vld [vmem:[%s207_s0] sm:$0x1]   ;;  %s135_s24 = smov 44   ;;  %s136_s25 = smov 40  }
   0x4   :  { %4 = vst.msk [vmem:[#allocation0] sm:$0x1] %vm3_vm0, %v2_v6   ;;  %v107_v7 = vld [vmem:[%s207_s0 + $0x9] sm:$0x1]   ;;  %v108_v8 = vld [vmem:[%s207_s0 + $0x8] sm:$0x1]  }
   0x5   :  { %s137_s30 = smov 36   ;;  %s138_s2 = smov 32   ;;  %v109_v9 = vld [vmem:[%s207_s0 + $0x7] sm:$0x1]   ;;  %v110_v10 = vld [vmem:[%s207_s0 + $0x6] sm:$0x1]  }
   0x6   :  { %13 = vrot.lane.b32.xlu0 %v102_v2, %s133_s16  ;;  %25 = vrot.lane.b32.xlu1 %v104_v3, %s134_s17  ;;  %s139_s7 = smov 28   ;;  %s140_s8 = smov 24   ;;  %v111_v11 = vld [vmem:[%s207_s0 + $0x5] sm:$0x1]   ;;  %v112_v12 = vld [vmem:[%s207_s0 + $0x4] sm:$0x1]  }
   0x7   :  { %s141_s13 = smov 20   ;;  %s142_s14 = smov 16   ;;  %v113_v13 = vld [vmem:[%s207_s0 + $0x3] sm:$0x1]   ;;  %v114_v14 = vld [vmem:[%s207_s0 + $0x2] sm:$0x1]  }
   0x8   :  { %s143_s19 = smov 12   ;;  %s144_s20 = smov 8   ;;  %v115_v15 = vld [vmem:[%s207_s0 + $0x1] sm:$0x1]   ;;  %vm27_vm4 = vcmask 425344   ;;  %vm33_vm5 = vcmask 392544  }
   0x9   :  { %s145_s0 = smov 4   ;;  %vm39_vm6 = vcmask 359744   ;;  %vm45_vm7 = vcmask 326944   ;;  %vm51_vm8 = vcmask 294144   ;;  %vm57_vm9 = vcmask 261344  }
   0xa   :  { %31 = vrot.lane.b32.xlu0 %v105_v4, %s135_s24  ;;  %37 = vrot.lane.b32.xlu1 %v106_v5, %s136_s25  ;;  %vm63_vm10 = vcmask 228544   ;;  %vm69_vm11 = vcmask 195744   ;;  %vm75_vm12 = vcmask 162944   ;;  %vm81_vm13 = vcmask 130144  }
   0xb   :  { %vm87_vm14 = vcmask 97344   ;;  %vm93_vm15 = vcmask 64544  }
   0xe   :  { %43 = vrot.lane.b32.xlu0 %v107_v7, %s137_s30  ;;  %49 = vrot.lane.b32.xlu1 %v108_v8, %s138_s2 }
  0x12   :  { %55 = vrot.lane.b32.xlu0 %v109_v9, %s139_s7  ;;  %61 = vrot.lane.b32.xlu1 %v110_v10, %s140_s8 }
  0x16   :  { %67 = vrot.lane.b32.xlu0 %v111_v11, %s141_s13  ;;  %73 = vrot.lane.b32.xlu1 %v112_v12, %s142_s14 }
  0x1a   :  { %79 = vrot.lane.b32.xlu0 %v113_v13, %s143_s19  ;;  %85 = vrot.lane.b32.xlu1 %v114_v14, %s144_s20 }
  0x1e   :  { %91 = vrot.lane.b32.xlu0 %v115_v15, %s145_s0 }
  0x74   :  { %v8_v16 = vpop.permute.xlu0 %7   ;;  %v20_v17 = vpop.permute.xlu1 %19  }
  0x75   :  { %10 = vst.msk [vmem:[#allocation0] sm:$0x1] %vm9_vm1, %v8_v16  }
  0x78   :  { %v14_v18 = vpop.permute.xlu0 %13   ;;  %v26_v19 = vpop.permute.xlu1 %25  }
  0x79   :  { %16 = vst.msk [vmem:[#allocation0] sm:$0x1] %vm15_vm2, %v14_v18  }
  0x7a   :  { %22 = vst.msk [vmem:[#allocation0] sm:$0x1] %vm21_vm3, %v20_v17  }
  0x7b   :  { %28 = vst.msk [vmem:[#allocation0] sm:$0x1] %vm27_vm4, %v26_v19  }
  0x7c   :  { %v32_v20 = vpop.permute.xlu0 %31   ;;  %v38_v21 = vpop.permute.xlu1 %37  }
  0x7d   :  { %34 = vst.msk [vmem:[#allocation0] sm:$0x1] %vm33_vm5, %v32_v20  }
  0x7e   :  { %40 = vst.msk [vmem:[#allocation0] sm:$0x1] %vm39_vm6, %v38_v21  }
  0x80   :  { %v44_v22 = vpop.permute.xlu0 %43   ;;  %v50_v23 = vpop.permute.xlu1 %49  }
  0x81   :  { %46 = vst.msk [vmem:[#allocation0] sm:$0x1] %vm45_vm7, %v44_v22  }
  0x82   :  { %52 = vst.msk [vmem:[#allocation0] sm:$0x1] %vm51_vm8, %v50_v23  }
  0x84   :  { %v56_v24 = vpop.permute.xlu0 %55   ;;  %v62_v25 = vpop.permute.xlu1 %61  }
  0x85   :  { %58 = vst.msk [vmem:[#allocation0] sm:$0x1] %vm57_vm9, %v56_v24  }
  0x86   :  { %64 = vst.msk [vmem:[#allocation0] sm:$0x1] %vm63_vm10, %v62_v25  }
  0x88   :  { %v68_v26 = vpop.permute.xlu0 %67   ;;  %v74_v27 = vpop.permute.xlu1 %73  }
  0x89   :  { %70 = vst.msk [vmem:[#allocation0] sm:$0x1] %vm69_vm11, %v68_v26  }
  0x8a   :  { %76 = vst.msk [vmem:[#allocation0] sm:$0x1] %vm75_vm12, %v74_v27  }
  0x8c   :  { %v80_v28 = vpop.permute.xlu0 %79   ;;  %v86_v29 = vpop.permute.xlu1 %85  }
  0x8d   :  { %82 = vst.msk [vmem:[#allocation0] sm:$0x1] %vm81_vm13, %v80_v28  }
  0x8e   :  { %88 = vst.msk [vmem:[#allocation0] sm:$0x1] %vm87_vm14, %v86_v29  }
  0x90   :  { %v92_v30 = vpop.permute.xlu0 %91  }
  0x91   :  { %94 = vst.msk [vmem:[#allocation0] sm:$0x1] %vm93_vm15, %v92_v30  }
  0x98   :  { %v98_v31 = vld [vmem:[#allocation0] sm:$0x1] }
  0x99   :  { %100 = vst [vmem:[%s208_s1] sm:$0x1] %v98_v31 }

// kernel: firstbody_forward.1
= control target key start
LH: loop header
LB: loop body
LE: loop exit
PB: predicated region body
PF: predicated region fallthrough
CT: control target
= control target key end

     0   :  { %s600_s12 = smov 0   ;;  %s795_s0 = inlined_call_operand.vmem [shape: f32[2,18,136], index: 0, kind: input, shape index: {}]   ;;  %s796_s1 = inlined_call_operand.vmem [shape: f32[9,128], index: 1, kind: input, shape index: {}]   ;;  %s797_s2 = inlined_call_operand.vmem [shape: f32[1,128], index: 2, kind: input, shape index: {}]   ;;  %s798_s3 = inlined_call_operand.vmem [shape: f32[2,16,128], index: 3, kind: output, shape index: {}]  }
   0x1 LB: > { %s542_s13 = sadd.s32 4294967295, %s574_s12   ;;  %p546_p0 = scmp.ge.s32.totalorder %s574_s12, 1  ;;  %s574_s12 = sphi %s600_s12, %s13_s12  }
   0x2   : > { %p137_p1 = scmp.lt.s32.totalorder %s574_s12, 3 }
   0x4   : > { %p138_p2 = pnand %p546_p0, %p137_p1 }
   0x5   : > { %v185_v0 = vlaneseq (!%p138_p2)  ;;  %v613_v2 = vld [vmem:[%s796_s1] sm:$0xff] (!%p138_p2)  ;;  %s576_s16 = smov (!%p138_p2), 4   ;;  %s577_s17 = smov (!%p138_p2), 8   ;;  %v551_v13 = vld [vmem:[%s796_s1 + $0x8] ss:$0 sm:$0xff] (!%p138_p2)  ;;  %vm381_vm0 = vcmask (!%p138_p2), 1045504  }
   0x6   : > { %141 = sbr.rel (%p138_p2) target bundleno = 307 (0x133), region = 32  ;;  %p161_p3 = scmp.lt.s32.totalorder (!%p138_p2), %s542_s13, 1  ;;  %vm269_vm1 = vcmask (!%p138_p2), 1046528   ;;  %vm217_vm2 = vcmask (!%p138_p2), 1014784   ;;  %vm248_vm3 = vcmask (!%p138_p2), 982016  }
   0x7   : > { %v608_v1 = vshrl.u32 (!%p138_p2), %v185_v0, 7  ;;  %s578_s24 = smov (!%p138_p2), 120   ;;  %s579_s25 = smov (!%p138_p2), 124  }
   0x9   : > { %v281_v3 = vsub.s32 (!%p138_p2), 4, %v608_v1  ;;  %v325_v4 = vsub.s32 (!%p138_p2), 5, %v608_v1  ;;  %v195_v5 = vsub.s32 (!%p138_p2), 1, %v608_v1  ;;  %v226_v6 = vsub.s32 (!%p138_p2), 2, %v608_v1 }
   0xa   : > { %v393_v11 = vsub.s32 (!%p138_p2), 7, %v608_v1  ;;  %v261_v41 = vsub.s32 (!%p138_p2), 3, %v608_v1 }
   0xb   : > { %v282_v7 = vrot.slane (!%p138_p2), %v613_v2, %v281_v3  ;;  %v196_v8 = vrot.slane (!%p138_p2), %v613_v2, %v195_v5  ;;  %v326_v9 = vrot.slane (!%p138_p2), %v613_v2, %v325_v4  ;;  %v227_v10 = vrot.slane (!%p138_p2), %v613_v2, %v226_v6 }
   0xc   : > { %v394_v12 = vrot.slane (!%p138_p2), %v613_v2, %v393_v11  ;;  %v262_v45 = vrot.slane (!%p138_p2), %v613_v2, %v261_v41  ;;  %v373_v5 = vsub.s32 (!%p138_p2), 6, %v608_v1 }
   0xd   : > { %284 = vrot.lane.b32.xlu1 %v282_v7, %s576_s16  ;;  %198 = vrot.lane.b32.xlu0 %v196_v8, %s576_s16  ;;  %s800_s13 = smov (!%p161_p3, %s542_s13), 1 }
   0xe   : > { %s555_s20 = smul.u32 48, %s800_s13  ;;  %s554_s28 = sshll.u32 %s800_s13, 4 }
   0xf   : > { %s170_s4 = scalar_lea.vmem %s798_s3, %s554_s28 }
  0x10   : > { %s636_s23 = scalar_lea.vmem %s795_s0, %s555_s20 }
  0x11   : > { %328 = vrot.lane.b32.xlu1 %v326_v9, %s577_s17  ;;  %229 = vrot.lane.b32.xlu0 %v227_v10, %s577_s17  ;;  %v639_v16 = vld [vmem:[%s636_s23 + $0x8] sm:$0xfc]  ;;  %v642_v17 = vld [vmem:[%s636_s23] sm:$0xfc]  ;;  %v374_v10 = vrot.slane %v613_v2, %v373_v5 }
  0x12   : > { %v647_v19 = vld [vmem:[%s636_s23 + $0x18] sm:$0xff]  ;;  %v650_v20 = vld [vmem:[%s636_s23 + $0x10] sm:$0xff]  ;;  %v182_v30 = vld [vmem:[%s636_s23 + $0x8] sm:$0xff] }
  0x13   : > { %v668_v31 = vld [vmem:[%s636_s23] sm:$0xff]  ;;  %v256_v39 = vld [vmem:[%s636_s23 + $0x8] sm:$0xfe]  ;;  %v258_v44 = vld [vmem:[%s636_s23 + $0x28] sm:$0x1]  ;;  %v264_v52 = vmul.f32 %v262_v45, %v650_v20 }
  0x14   : > { %v255_v40 = vld [vmem:[%s636_s23] sm:$0xfe]  ;;  %v257_v50 = vld [vmem:[%s636_s23 + $0x20] sm:$0x1] }
  0x15   : > { %440 = vrot.lane.b32.xlu1 %v551_v13, %s577_s17  ;;  %396 = vrot.lane.b32.xlu0 %v394_v12, %s576_s16  ;;  %v263_v51 = vmul.f32 %v262_v45, %v255_v40  ;;  %v265_v53 = vmul.f32 %v262_v45, %v257_v50  ;;  %v271_v57 = vrot.slane %v264_v52, 1  ;;  %v370_v52 = vld [vmem:[%s636_s23 + $0x28] sm:$0x3] }
  0x17   : > { %v270_v56 = vrot.slane %v263_v51, 1  ;;  %v273_v58 = vrot.slane %v265_v53, 1 }
  0x19   : > { %v700_v3 = vsel %vm269_vm1, %v270_v56, %v271_v57  ;;  %v703_v4 = vsel %vm269_vm1, %v271_v57, %v273_v58 }
  0x7f   : > { %v285_v14 = vpop.permute.xlu1 %284  ;;  %v199_v29 = vpop.permute.xlu0 %198 }
  0x80   : > { %v202_v34 = vmul.f32 %v199_v29, %v182_v30  ;;  %v201_v35 = vmul.f32 %v199_v29, %v668_v31  ;;  %v204_v37 = vmul.f32 %v199_v29, %v647_v19  ;;  %v203_v38 = vmul.f32 %v199_v29, %v650_v20 }
  0x81   : > { %v288_v46 = vmul.f32 %v285_v14, %v256_v39  ;;  %v290_v47 = vmul.f32 %v285_v14, %v647_v19  ;;  %v287_v48 = vmul.f32 %v285_v14, %v255_v40  ;;  %v289_v49 = vmul.f32 %v285_v14, %v650_v20 }
  0x82   : > { %v292_v54 = vmul.f32 %v285_v14, %v258_v44  ;;  %v291_v55 = vmul.f32 %v285_v14, %v257_v50 }
  0x83   : > { %v631_v15 = vpop.permute.xlu1 %328  ;;  %v230_v36 = vpop.permute.xlu0 %229  ;;  %v302_v59 = vrot.slane %v288_v46, 1  ;;  %v303_v60 = vrot.slane %v290_v47, 1  ;;  %v299_v61 = vrot.slane %v287_v48, 1  ;;  %v300_v62 = vrot.slane %v289_v49, 1 }
  0x84   : > { %v233_v42 = vmul.f32 %v230_v36, %v182_v30  ;;  %v232_v43 = vmul.f32 %v230_v36, %v668_v31  ;;  %v235_v63 = vmul.f32 %v230_v36, %v647_v19  ;;  %v234_v0 = vmul.f32 %v230_v36, %v650_v20 }
  0x85   : > { %v307_v6 = vrot.slane %v292_v54, 1  ;;  %v305_v7 = vrot.slane %v291_v55, 1  ;;  %v304_v8 = vsel %vm269_vm1, %v302_v59, %v303_v60  ;;  %v301_v9 = vsel %vm269_vm1, %v299_v61, %v300_v62 }
  0x86   : > { %v332_v11 = vmul.f32 %v631_v15, %v256_v39  ;;  %v334_v12 = vmul.f32 %v631_v15, %v647_v19  ;;  %v331_v13 = vmul.f32 %v631_v15, %v255_v40  ;;  %v333_v14 = vmul.f32 %v631_v15, %v650_v20  ;;  %v369_v39 = vld [vmem:[%s636_s23 + $0x20] sm:$0x3] }
  0x87   : > { %v644_v18 = vpop.permute.xlu1 %440  ;;  %v397_v29 = vpop.permute.xlu0 %396  ;;  %v336_v30 = vmul.f32 %v631_v15, %v258_v44  ;;  %v377_v41 = vmul.f32 %v374_v10, %v369_v39 }
  0x88   : > { %v444_v21 = vmul.f32 %v644_v18, %v639_v16  ;;  %v656_v22 = vmul.f32 %v644_v18, %v647_v19  ;;  %v443_v23 = vmul.f32 %v644_v18, %v642_v17  ;;  %v662_v24 = vmul.f32 %v644_v18, %v650_v20 }
  0x89   : > { %v347_v36 = vrot.slane %v334_v12, 1  ;;  %v401_v44 = vmul.f32 %v397_v29, %v650_v20  ;;  %v385_v45 = vrot.slane %v377_v41, 2  ;;  %v351_v48 = vrot.slane %v336_v30, 1 }
  0x8a   : > { %v458_v25 = vrot.slane %v444_v21, 2  ;;  %v459_v26 = vrot.slane %v656_v22, 2  ;;  %v455_v27 = vrot.slane %v443_v23, 2  ;;  %v456_v28 = vrot.slane %v662_v24, 2  ;;  %v550_v24 = vld [vmem:[%s797_s2] ss:$0 sm:$0xff] }
  0x8b   : > { %v375_v21 = vmul.f32 %v374_v10, %v642_v17  ;;  %v376_v23 = vmul.f32 %v374_v10, %v650_v20  ;;  %v352_v53 = vsel %vm269_vm1, %v347_v36, %v351_v48  ;;  %v404_v55 = vmul.f32 %v397_v29, %v370_v52 }
  0x8c   : > { %v460_v32 = vsel %vm381_vm0, %v458_v25, %v459_v26  ;;  %v457_v33 = vsel %vm381_vm0, %v455_v27, %v456_v28  ;;  %v308_v25 = vsel %vm269_vm1, %v303_v60, %v307_v6  ;;  %v306_v27 = vsel %vm269_vm1, %v300_v62, %v305_v7 }
  0x8d   : > { %467 = vrot.lane.b32.xlu1 %v460_v32, %s578_s24  ;;  %465 = vrot.lane.b32.xlu0 %v457_v33, %s578_s24  ;;  %v335_v32 = vmul.f32 %v631_v15, %v257_v50  ;;  %v382_v33 = vrot.slane %v375_v21, 2  ;;  %v402_v15 = vmul.f32 %v397_v29, %v647_v19  ;;  %v403_v56 = vmul.f32 %v397_v29, %v369_v39 }
  0x8e   : > { %v419_v59 = vrot.slane %v404_v55, 2  ;;  %v448_v61 = vmul.f32 %v644_v18, %v370_v52  ;;  %v447_v62 = vmul.f32 %v644_v18, %v369_v39 }
  0x8f   : > { %v349_v49 = vrot.slane %v335_v32, 1  ;;  %v415_v19 = vrot.slane %v402_v15, 2  ;;  %v417_v60 = vrot.slane %v403_v56, 2 }
  0x90   : > { %v463_v5 = vrot.slane %v448_v61, 2  ;;  %v461_v6 = vrot.slane %v447_v62, 2 }
  0x91   : > { %211 = vrot.lane.b32.xlu1 %v202_v34, %s579_s25  ;;  %209 = vrot.lane.b32.xlu0 %v201_v35, %s579_s25  ;;  %v383_v34 = vrot.slane %v376_v23, 2  ;;  %v346_v35 = vrot.slane %v332_v11, 1 }
  0x92   : > { %v464_v7 = vsel %vm381_vm0, %v459_v26, %v463_v5  ;;  %v462_v18 = vsel %vm381_vm0, %v456_v28, %v461_v6 }
  0x93   : > { %v729_v40 = vsel %vm381_vm0, %v382_v33, %v383_v34  ;;  %v348_v46 = vsel %vm269_vm1, %v346_v35, %v347_v36 }
  0x95   : > { %215 = vrot.lane.b32.xlu1 %v204_v37, %s579_s25  ;;  %213 = vrot.lane.b32.xlu0 %v203_v38, %s579_s25  ;;  %v343_v37 = vrot.slane %v331_v13, 1  ;;  %v344_v38 = vrot.slane %v333_v14, 1 }
  0x97   : > { %v345_v47 = vsel %vm269_vm1, %v343_v37, %v344_v38  ;;  %v350_v54 = vsel %vm269_vm1, %v344_v38, %v349_v49 }
  0x99   : > { %242 = vrot.lane.b32.xlu1 %v233_v42, %s578_s24  ;;  %240 = vrot.lane.b32.xlu0 %v232_v43, %s578_s24  ;;  %v400_v42 = vmul.f32 %v397_v29, %v639_v16  ;;  %v399_v43 = vmul.f32 %v397_v29, %v642_v17  ;;  %v740_v16 = vsel %vm381_vm0, %v383_v34, %v385_v45  ;;  %v412_v17 = vrot.slane %v401_v44, 2 }
  0x9b   : > { %v414_v50 = vrot.slane %v400_v42, 2  ;;  %v411_v51 = vrot.slane %v399_v43, 2 }
  0x9d   : > { %246 = vrot.lane.b32.xlu1 %v235_v63, %s578_s24  ;;  %244 = vrot.lane.b32.xlu0 %v234_v0, %s578_s24  ;;  %v416_v57 = vsel %vm381_vm0, %v414_v50, %v415_v19  ;;  %v413_v58 = vsel %vm381_vm0, %v411_v51, %v412_v17  ;;  %v420_v63 = vsel %vm381_vm0, %v415_v19, %v419_v59 }
  0x9e   : > { %v418_v0 = vsel %vm381_vm0, %v412_v17, %v417_v60 }
  0xa1   : > { %311 = vrot.lane.b32.xlu1 %v304_v8, %s579_s25  ;;  %309 = vrot.lane.b32.xlu0 %v301_v9, %s579_s25  ;;  %v187_v8 = vsub.s32 0, %v608_v1 }
  0xa3   : > { %v188_v11 = vrot.slane %v613_v2, %v187_v8 }
  0xa5   : > { %315 = vrot.lane.b32.xlu1 %v308_v25, %s579_s25  ;;  %313 = vrot.lane.b32.xlu0 %v306_v27, %s579_s25  ;;  %v189_v22 = vmul.f32 %v188_v11, %v668_v31  ;;  %v190_v14 = vmul.f32 %v188_v11, %v650_v20 }
  0xa7   : > { %v191_v26 = vadd.f32 %v550_v24, %v189_v22  ;;  %v192_v25 = vadd.f32 %v550_v24, %v190_v14 }
  0xa9   : > { %355 = vrot.lane.b32.xlu1 %v348_v46, %s578_s24  ;;  %353 = vrot.lane.b32.xlu0 %v345_v47, %s578_s24 }
  0xad   : > { %359 = vrot.lane.b32.xlu1 %v352_v53, %s578_s24  ;;  %357 = vrot.lane.b32.xlu0 %v350_v54, %s578_s24 }
  0xb1   : > { %423 = vrot.lane.b32.xlu1 %v416_v57, %s579_s25  ;;  %421 = vrot.lane.b32.xlu0 %v413_v58, %s579_s25 }
  0xb5   : > { %427 = vrot.lane.b32.xlu1 %v420_v63, %s579_s25  ;;  %425 = vrot.lane.b32.xlu0 %v418_v0, %s579_s25 }
  0xb9   : > { %471 = vrot.lane.b32.xlu1 %v464_v7, %s578_s24  ;;  %469 = vrot.lane.b32.xlu0 %v462_v18, %s578_s24 }
  0xff   : > { %v468_v9 = vpop.permute.xlu1 %467  ;;  %v466_v10 = vpop.permute.xlu0 %465 }
 0x100   : > { %v473_v56 = vsel %vm248_vm3, %v466_v10, %v468_v9 }
 0x103   : > { %v212_v12 = vpop.permute.xlu1 %211  ;;  %v210_v13 = vpop.permute.xlu0 %209 }
 0x104   : > { %v218_v1 = vsel %vm217_vm2, %v210_v13, %v212_v12 }
 0x105   : > { %v222_v23 = vadd.f32 %v218_v1, %v191_v26 }
 0x107   : > { %v216_v28 = vpop.permute.xlu1 %215  ;;  %v214_v21 = vpop.permute.xlu0 %213 }
 0x108   : > { %v219_v29 = vsel %vm217_vm2, %v214_v21, %v216_v28 }
 0x109   : > { %v223_v32 = vadd.f32 %v219_v29, %v192_v25 }
 0x10b   : > { %v243_v2 = vpop.permute.xlu1 %242  ;;  %v241_v27 = vpop.permute.xlu0 %240 }
 0x10c   : > { %v249_v31 = vsel %vm248_vm3, %v241_v27, %v243_v2 }
 0x10d   : > { %v253_v30 = vadd.f32 %v249_v31, %v222_v23 }
 0x10f   : > { %v247_v33 = vpop.permute.xlu1 %246  ;;  %v245_v34 = vpop.permute.xlu0 %244  ;;  %v277_v35 = vadd.f32 %v700_v3, %v253_v30 }
 0x110   : > { %v250_v20 = vsel %vm248_vm3, %v245_v34, %v247_v33 }
 0x111   : > { %v254_v36 = vadd.f32 %v250_v20, %v223_v32 }
 0x113   : > { %v312_v37 = vpop.permute.xlu1 %311  ;;  %v310_v38 = vpop.permute.xlu0 %309  ;;  %v278_v39 = vadd.f32 %v703_v4, %v254_v36 }
 0x114   : > { %v317_v15 = vsel %vm217_vm2, %v310_v38, %v312_v37 }
 0x115   : > { %v321_v43 = vadd.f32 %v317_v15, %v277_v35 }
 0x117   : > { %v316_v41 = vpop.permute.xlu1 %315  ;;  %v314_v42 = vpop.permute.xlu0 %313 }
 0x118   : > { %v318_v46 = vsel %vm217_vm2, %v314_v42, %v316_v41 }
 0x119   : > { %v322_v48 = vadd.f32 %v318_v46, %v278_v39 }
 0x11b   : > { %v356_v44 = vpop.permute.xlu1 %355  ;;  %v354_v45 = vpop.permute.xlu0 %353 }
 0x11c   : > { %v361_v47 = vsel %vm248_vm3, %v354_v45, %v356_v44 }
 0x11d   : > { %v365_v3 = vadd.f32 %v361_v47, %v321_v43 }
 0x11f   : > { %v360_v49 = vpop.permute.xlu1 %359  ;;  %v358_v50 = vpop.permute.xlu0 %357  ;;  %v389_v19 = vadd.f32 %v729_v40, %v365_v3 }
 0x120   : > { %v362_v4 = vsel %vm248_vm3, %v358_v50, %v360_v49 }
 0x121   : > { %v366_v51 = vadd.f32 %v362_v4, %v322_v48 }
 0x123   : > { %v424_v17 = vpop.permute.xlu1 %423  ;;  %v422_v52 = vpop.permute.xlu0 %421  ;;  %v390_v53 = vadd.f32 %v740_v16, %v366_v51 }
 0x124   : > { %v429_v54 = vsel %vm217_vm2, %v422_v52, %v424_v17 }
 0x125   : > { %v433_v55 = vadd.f32 %v429_v54, %v389_v19 }
 0x127   : > { %v477_v57 = vadd.f32 %v473_v56, %v433_v55  ;;  %v428_v58 = vpop.permute.xlu1 %427  ;;  %v426_v59 = vpop.permute.xlu0 %425 }
 0x128   : > { %v430_v60 = vsel %vm217_vm2, %v426_v59, %v428_v58 }
 0x129   : > { %vm479_vm4 = vcmp.gt.f32.partialorder %v477_v57, 0.0  ;;  %v481_v40 = vmul.f32 0.01, %v477_v57  ;;  %v434_v62 = vadd.f32 %v430_v60, %v390_v53 }
 0x12b   : > { %v483_v61 = vsel %vm479_vm4, %v477_v57, %v481_v40  ;;  %v472_v16 = vpop.permute.xlu1 %471  ;;  %v470_v63 = vpop.permute.xlu0 %469 }
 0x12c   : > { %v474_v0 = vsel %vm248_vm3, %v470_v63, %v472_v16  ;;  %485 = vst [vmem:[%s170_s4] sm:$0xff] %v483_v61 }
 0x12d   : > { %v478_v5 = vadd.f32 %v474_v0, %v434_v62 }
 0x12f   : > { %vm480_vm5 = vcmp.gt.f32.partialorder %v478_v5, 0.0  ;;  %v482_v6 = vmul.f32 0.01, %v478_v5 }
 0x131   : > { %v484_v7 = vsel %vm480_vm5, %v478_v5, %v482_v6 }
 0x132   : > { %486 = vst [vmem:[%s170_s4 + $0x8] sm:$0xff] %v484_v7 }
 0x133 PF: > { %s13_s12 = sadd.s32 1, %s574_s12  }
 0x134   : > { %p10_p4 = scmp.ge.s32.totalorder %s13_s12, 4  }
 0x136   :  { %12 = sbr.rel (!%p10_p4) target bundleno = 1 (0x1), region = 62 }

</bundles_post_ra>
